<compile_context>
chip_gen: v7x
topology: tpu7x:2x2x1
jax: 0.10.0
libtpu: 0.0.40
codegen_flags: <defaults>
</compile_context>

<pallas_src>
import jax
import jax.numpy as jnp
from jax.experimental import pallas as pl
from jax.experimental.pallas import tpu as pltpu

BN_EPS = 1e-5
MXU_DTYPE = jnp.bfloat16  # matmul *operand* dtype; accumulation stays f32


# ---------------------------------------------------------------------------
# Shared math (used by the Pallas kernel AND the XLA references)
# ---------------------------------------------------------------------------
def _mxu_linear(h, w, b):
    # bf16 operands -> native MXU on v5e/v6e/v7x; f32 accumulation + bias.
    return jnp.dot(h.astype(MXU_DTYPE), w.astype(MXU_DTYPE),
                   preferred_element_type=jnp.float32) + b


def _f32_linear(h, w, b):
    # Full-precision reference path (PyTorch-faithful numerics).
    return jnp.dot(h, w, preferred_element_type=jnp.float32,
                   precision=jax.lax.Precision.HIGHEST) + b


def _batchnorm_train(y, gamma, beta):
    # Training-mode BatchNorm1d: biased batch variance over the batch axis.
    # Centered values computed once; gamma folded into the rsqrt scale.
    mean = jnp.mean(y, axis=0, keepdims=True)
    yc = y - mean
    var = jnp.mean(yc * yc, axis=0, keepdims=True)
    scale = gamma * jax.lax.rsqrt(var + BN_EPS)
    return yc * scale + beta


def _block(h, w, bnp, *, relu_first, lin):
    # bnp rows: [0]=linear bias, [1]=BN gamma, [2]=BN beta
    b, gamma, beta = bnp[0:1, :], bnp[1:2, :], bnp[2:3, :]
    y = lin(h, w, b)
    if relu_first:                     # nn.Linear -> ReLU -> BatchNorm1d
        return _batchnorm_train(jnp.maximum(y, 0.0), gamma, beta)
    return jnp.maximum(_batchnorm_train(y, gamma, beta), 0.0)  # Lin->BN->ReLU


def _forward_core(x, eps, w_in, w_hid, w_fc, w_dec0, w_out, bn, b_fc, b_out,
                  *, lin):
    """Whole FC_VAE forward.  `w_hid` / `bn` may be Pallas Refs (only indexed
    with a static leading index) or plain arrays."""
    nz = eps.shape[-1]

    # ----- Encoder -----
    h = _block(x, w_in, bn[0], relu_first=True, lin=lin)
    h = _block(h, w_hid[0], bn[1], relu_first=False, lin=lin)
    h = _block(h, w_hid[1], bn[2], relu_first=False, lin=lin)
    h = _block(h, w_hid[2], bn[3], relu_first=False, lin=lin)

    # Merged fc1/fc2 head: one matmul, [mu | logvar] kept packed (lane-denser
    # output slab; the split happens in the JAX wrapper).
    ml = lin(h, w_fc, b_fc)
    mu, logvar = ml[:, :nz], ml[:, nz:]

    # ----- Reparametrize: eps * exp(0.5*logvar) + mu  (EUP exp, ~free slot) --
    z = eps * jnp.exp(0.5 * logvar) + mu

    # ----- Decoder -----
    d = _block(z, w_dec0, bn[4], relu_first=True, lin=lin)
    d = _block(d, w_hid[3], bn[5], relu_first=False, lin=lin)
    d = _block(d, w_hid[4], bn[6], relu_first=False, lin=lin)
    res = lin(d, w_out, b_out)
    return res, ml, z


# ---------------------------------------------------------------------------
# Pallas kernel (straight-line body; everything resident in VMEM)
# ---------------------------------------------------------------------------
def _fc_vae_kernel(x_ref, eps_ref, w_in_ref, w_hid_ref, w_fc_ref, w_dec0_ref,
                   w_out_ref, bn_ref, b_fc_ref, b_out_ref,
                   res_ref, ml_ref, z_ref):
    res, ml, z = _forward_core(
        x_ref[...], eps_ref[...], w_in_ref[...],
        w_hid_ref,               # Ref: indexed per-layer (avoids a stack copy)
        w_fc_ref[...], w_dec0_ref[...], w_out_ref[...],
        bn_ref,                  # Ref: indexed per-layer
        b_fc_ref[...], b_out_ref[...],
        lin=_mxu_linear)
    res_ref[...] = res.astype(res_ref.dtype)
    ml_ref[...] = ml.astype(ml_ref.dtype)
    z_ref[...] = z.astype(z_ref.dtype)


# ---------------------------------------------------------------------------
# Wrapper: one grid-free pallas_call for the whole forward pass
# ---------------------------------------------------------------------------
@jax.jit
def fc_vae_forward(params, x, eps):
    B, data_size = x.shape
    nz = eps.shape[-1]
    H = params["w_hid"].shape[-1]          # max(n_hidden, last_hidden)

    inputs = (x, eps,
              params["w_in"], params["w_hid"], params["w_fc"],
              params["w_dec0"], params["w_out"], params["bn"],
              params["b_fc"], params["b_out"])

    out_shape = (
        jax.ShapeDtypeStruct((B, data_size), jnp.float32),   # res
        jax.ShapeDtypeStruct((B, 2 * nz), jnp.float32),      # [mu | logvar]
        jax.ShapeDtypeStruct((B, nz), jnp.float32),          # z
    )

    vmem_spec = pl.BlockSpec(memory_space=pltpu.MemorySpace.VMEM)

    # Advisory cost + explicit VMEM budget (single-buffered, grid-free).
    in_bytes = sum(int(a.size) * a.dtype.itemsize for a in inputs)
    out_bytes = 4 * (B * data_size + B * 3 * nz)
    io_bytes = in_bytes + out_bytes
    flops = 2 * B * (data_size * H        # encoder input layer
                     + 5 * H * H          # stacked hidden layers
                     + H * 2 * nz         # merged mu/logvar head
                     + nz * H             # decoder input layer
                     + H * data_size)     # final linear
    transcendentals = B * nz + 7 * H      # exp (reparam) + rsqrt (7 BN layers)
    vmem_limit = int(min(max(8 * io_bytes, 16 << 20), 64 << 20))

    res, ml, z = pl.pallas_call(
        _fc_vae_kernel,
        out_shape=out_shape,
        in_specs=[vmem_spec] * len(inputs),
        out_specs=(vmem_spec, vmem_spec, vmem_spec),
        compiler_params=pltpu.CompilerParams(vmem_limit_bytes=vmem_limit),
        cost_estimate=pl.CostEstimate(flops=flops,
                                      transcendentals=transcendentals,
                                      bytes_accessed=io_bytes),
    )(*inputs)

    mu, logvar = ml[:, :nz], ml[:, nz:]
    return res, z, mu, logvar


# ---------------------------------------------------------------------------
# Parameter construction (nn.Linear / nn.BatchNorm1d defaults), packed/padded
# ---------------------------------------------------------------------------
def init_fc_vae_params(key, data_size, hidden_size, n_hidden, last_hidden=None):
    nz = hidden_size
    lh = n_hidden if last_hidden is None else last_hidden
    H = max(n_hidden, lh)                  # common padded hidden width

    def linear(k, din, dout):
        kw, kb = jax.random.split(k)
        bound = 1.0 / float(din) ** 0.5
        w = jax.random.uniform(kw, (din, dout), jnp.float32, -bound, bound)
        b = jax.random.uniform(kb, (dout,), jnp.float32, -bound, bound)
        return w, b

    def pad2(w, rows, cols):
        # Zero-padding is mathematically neutral through Linear/ReLU/BN here.
        return jnp.pad(w, ((0, rows - w.shape[0]), (0, cols - w.shape[1])))

    def bn_pack(bias, dout):
        # rows: [0]=linear bias, [1]=BN gamma (default 1), [2]=BN beta (0)
        pack = jnp.zeros((3, H), jnp.float32)
        pack = pack.at[0, :dout].set(bias)
        pack = pack.at[1, :].set(1.0)
        return pack

    k = jax.random.split(key, 10)
    p = {}
    bn_list, hid_ws = [], []

    # Encoder: Lin+ReLU+BN, then 3x Lin+BN+ReLU
    w, b = linear(k[0], data_size, n_hidden)
    p["w_in"] = pad2(w, data_size, H)
    bn_list.append(bn_pack(b, n_hidden))
    for i in (1, 2):
        w, b = linear(k[i], n_hidden, n_hidden)
        hid_ws.append(pad2(w, H, H)); bn_list.append(bn_pack(b, n_hidden))
    w, b = linear(k[3], n_hidden, lh)
    hid_ws.append(pad2(w, H, H)); bn_list.append(bn_pack(b, lh))

    # fc1 (mu) and fc2 (logvar) merged into one weight / bias
    w1, b1 = linear(k[4], lh, nz)
    w2, b2 = linear(k[5], lh, nz)
    p["w_fc"] = pad2(jnp.concatenate([w1, w2], axis=1), H, 2 * nz)
    p["b_fc"] = jnp.concatenate([b1, b2])[None, :]                # (1, 2*nz)

    # Decoder: Lin+ReLU+BN, 2x Lin+BN+ReLU, plain Lin
    w, b = linear(k[6], nz, lh)
    p["w_dec0"] = pad2(w, nz, H); bn_list.append(bn_pack(b, lh))
    w, b = linear(k[7], lh, n_hidden)
    hid_ws.append(pad2(w, H, H)); bn_list.append(bn_pack(b, n_hidden))
    w, b = linear(k[8], n_hidden, n_hidden)
    hid_ws.append(pad2(w, H, H)); bn_list.append(bn_pack(b, n_hidden))
    w, b = linear(k[9], n_hidden, data_size)
    p["w_out"] = pad2(w, H, data_size)
    p["b_out"] = b[None, :]                                        # (1, ds)

    p["w_hid"] = jnp.stack(hid_ws)    # (5, H, H): enc1, enc2, enc3, dec1, dec2
    p["bn"] = jnp.stack(bn_list)      # (7, 3, H): enc0..enc3, dec0..dec2
    return p


# ---------------------------------------------------------------------------
# XLA references for the correctness check
# ---------------------------------------------------------------------------
def _reference(params, x, eps, lin):
    return _forward_core(x, eps, params["w_in"], params["w_hid"],
                         params["w_fc"], params["w_dec0"], params["w_out"],
                         params["bn"], params["b_fc"], params["b_out"],
                         lin=lin)


@jax.jit
def _mirrored_reference(params, x, eps):     # identical math (bf16 operands)
    return _reference(params, x, eps, _mxu_linear)


@jax.jit
def _f32_reference(params, x, eps):          # PyTorch-faithful full-f32 math
    return _reference(params, x, eps, _f32_linear)


# ---------------------------------------------------------------------------
if __name__ == "__main__":
    batch = 8
    data_size = 32
    hidden_size = 16    # nz
    n_hidden = 64
    last_hidden = None  # -> n_hidden

    key = jax.random.PRNGKey(0)
    k_params, k_x, k_eps = jax.random.split(key, 3)

    params = init_fc_vae_params(k_params, data_size, hidden_size, n_hidden,
                                last_hidden)
    x = jax.random.normal(k_x, (batch, data_size), jnp.float32)
    # eps ~ N(0,1) supplied explicitly (matches torch.FloatTensor(...).normal_())
    eps = jax.random.normal(k_eps, (batch, hidden_size), jnp.float32)

    res, z, mu, logvar = fc_vae_forward(params, x, eps)
    jax.block_until_ready((res, z, mu, logvar))

    assert res.shape == (batch, data_size)
    assert z.shape == (batch, hidden_size)
    assert mu.shape == (batch, hidden_size)
    assert logvar.shape == (batch, hidden_size)
    for a in (res, z, mu, logvar):
        assert bool(jnp.all(jnp.isfinite(a)))

    # Tight check: XLA reference with identical math (bf16 MXU operands).
    r_res, r_ml, r_z = _mirrored_reference(params, x, eps)
    for got, want in ((res, r_res), (mu, r_ml[:, :hidden_size]),
                      (logvar, r_ml[:, hidden_size:]), (z, r_z)):
        assert float(jnp.max(jnp.abs(got - want))) < 5e-3

    # Loose semantic check vs. the full-f32 PyTorch-faithful reference; the
    # gap here is the expected bf16-operand matmul error amplified by BN.
    f_res, f_ml, f_z = _f32_reference(params, x, eps)
    for got, want in ((res, f_res), (mu, f_ml[:, :hidden_size]),
                      (logvar, f_ml[:, hidden_size:]), (z, f_z)):
        assert float(jnp.max(jnp.abs(got - want))) < 2.5e-1

    print("KERNEL_OK")
</pallas_src>

<mosaic_0001>
module attributes {stable_mosaic.version = 11 : i64} {
  func.func @_fc_vae_kernel(%arg0: memref<8x32xf32, #tpu.memory_space<vmem>>, %arg1: memref<8x16xf32, #tpu.memory_space<vmem>>, %arg2: memref<32x64xf32, #tpu.memory_space<vmem>>, %arg3: memref<5x64x64xf32, #tpu.memory_space<vmem>>, %arg4: memref<64x32xf32, #tpu.memory_space<vmem>>, %arg5: memref<16x64xf32, #tpu.memory_space<vmem>>, %arg6: memref<64x32xf32, #tpu.memory_space<vmem>>, %arg7: memref<7x3x64xf32, #tpu.memory_space<vmem>>, %arg8: memref<1x32xf32, #tpu.memory_space<vmem>>, %arg9: memref<1x32xf32, #tpu.memory_space<vmem>>, %arg10: memref<8x32xf32, #tpu.memory_space<vmem>>, %arg11: memref<8x32xf32, #tpu.memory_space<vmem>>, %arg12: memref<8x16xf32, #tpu.memory_space<vmem>>) attributes {dimension_semantics = [], scalar_prefetch = 0 : i64, scratch_operands = 0 : i64, tpu.core_type = #tpu.core_type<tc>} {
    %c0 = arith.constant 0 : index
    %c0_0 = arith.constant 0 : index
    %0 = vector.load %arg0[%c0, %c0_0] : memref<8x32xf32, #tpu.memory_space<vmem>>, vector<8x32xf32>
    %c0_1 = arith.constant 0 : index
    %c0_2 = arith.constant 0 : index
    %1 = vector.load %arg1[%c0_1, %c0_2] : memref<8x16xf32, #tpu.memory_space<vmem>>, vector<8x16xf32>
    %c0_3 = arith.constant 0 : index
    %c0_4 = arith.constant 0 : index
    %2 = vector.load %arg2[%c0_3, %c0_4] : memref<32x64xf32, #tpu.memory_space<vmem>>, vector<32x64xf32>
    %c0_5 = arith.constant 0 : index
    %c0_6 = arith.constant 0 : index
    %3 = vector.load %arg4[%c0_5, %c0_6] : memref<64x32xf32, #tpu.memory_space<vmem>>, vector<64x32xf32>
    %c0_7 = arith.constant 0 : index
    %c0_8 = arith.constant 0 : index
    %4 = vector.load %arg5[%c0_7, %c0_8] : memref<16x64xf32, #tpu.memory_space<vmem>>, vector<16x64xf32>
    %c0_9 = arith.constant 0 : index
    %c0_10 = arith.constant 0 : index
    %5 = vector.load %arg6[%c0_9, %c0_10] : memref<64x32xf32, #tpu.memory_space<vmem>>, vector<64x32xf32>
    %c0_11 = arith.constant 0 : index
    %c0_12 = arith.constant 0 : index
    %6 = vector.load %arg8[%c0_11, %c0_12] : memref<1x32xf32, #tpu.memory_space<vmem>>, vector<1x32xf32>
    %c0_13 = arith.constant 0 : index
    %c0_14 = arith.constant 0 : index
    %7 = vector.load %arg9[%c0_13, %c0_14] : memref<1x32xf32, #tpu.memory_space<vmem>>, vector<1x32xf32>
    %c0_15 = arith.constant 0 : index
    %c0_16 = arith.constant 0 : index
    %c0_17 = arith.constant 0 : index
    %8 = vector.load %arg7[%c0_15, %c0_16, %c0_17] : memref<7x3x64xf32, #tpu.memory_space<vmem>>, vector<1x3x64xf32>
    %9 = vector.shape_cast %8 : vector<1x3x64xf32> to vector<3x64xf32>
    %10 = vector.extract_strided_slice %9 {offsets = [0, 0], sizes = [1, 64], strides = [1, 1]} : vector<3x64xf32> to vector<1x64xf32>
    %11 = vector.extract_strided_slice %9 {offsets = [1, 0], sizes = [1, 64], strides = [1, 1]} : vector<3x64xf32> to vector<1x64xf32>
    %12 = vector.extract_strided_slice %9 {offsets = [2, 0], sizes = [1, 64], strides = [1, 1]} : vector<3x64xf32> to vector<1x64xf32>
    %13 = arith.truncf %0 : vector<8x32xf32> to vector<8x32xbf16>
    %14 = arith.truncf %2 : vector<32x64xf32> to vector<32x64xbf16>
    %cst = arith.constant dense<0.000000e+00> : vector<8x64xf32>
    %15 = tpu.matmul %13, %14, %cst {dimension_numbers = #tpu.dot_dimension_numbers<[1], [0], [0], [1], [0, 0, 1, 1], [], []>} : vector<8x32xbf16>, vector<32x64xbf16>, vector<8x64xf32> -> vector<8x64xf32>
    %16 = vector.broadcast %10 : vector<1x64xf32> to vector<8x64xf32>
    %17 = arith.addf %15, %16 : vector<8x64xf32>
    %cst_18 = arith.constant 0.000000e+00 : f32
    %18 = vector.broadcast %cst_18 : f32 to vector<8x64xf32>
    %19 = arith.maximumf %17, %18 : vector<8x64xf32>
    %cst_19 = arith.constant dense<0.000000e+00> : vector<64xf32>
    %20 = vector.multi_reduction <add>, %19, %cst_19 [0] : vector<8x64xf32> to vector<64xf32>
    %21 = vector.shape_cast %20 : vector<64xf32> to vector<1x64xf32>
    %cst_20 = arith.constant 8.000000e+00 : f32
    %22 = vector.broadcast %cst_20 : f32 to vector<1x64xf32>
    %23 = arith.divf %21, %22 : vector<1x64xf32>
    %24 = vector.broadcast %23 : vector<1x64xf32> to vector<8x64xf32>
    %25 = arith.subf %19, %24 : vector<8x64xf32>
    %26 = arith.mulf %25, %25 : vector<8x64xf32>
    %cst_21 = arith.constant dense<0.000000e+00> : vector<64xf32>
    %27 = vector.multi_reduction <add>, %26, %cst_21 [0] : vector<8x64xf32> to vector<64xf32>
    %28 = vector.shape_cast %27 : vector<64xf32> to vector<1x64xf32>
    %cst_22 = arith.constant 8.000000e+00 : f32
    %29 = vector.broadcast %cst_22 : f32 to vector<1x64xf32>
    %30 = arith.divf %28, %29 : vector<1x64xf32>
    %cst_23 = arith.constant 9.99999974E-6 : f32
    %31 = vector.broadcast %cst_23 : f32 to vector<1x64xf32>
    %32 = arith.addf %30, %31 : vector<1x64xf32>
    %33 = math.rsqrt %32 : vector<1x64xf32>
    %34 = arith.mulf %11, %33 : vector<1x64xf32>
    %35 = vector.broadcast %34 : vector<1x64xf32> to vector<8x64xf32>
    %36 = arith.mulf %25, %35 : vector<8x64xf32>
    %37 = vector.broadcast %12 : vector<1x64xf32> to vector<8x64xf32>
    %38 = arith.addf %36, %37 : vector<8x64xf32>
    %c0_24 = arith.constant 0 : index
    %c0_25 = arith.constant 0 : index
    %c0_26 = arith.constant 0 : index
    %39 = vector.load %arg3[%c0_24, %c0_25, %c0_26] : memref<5x64x64xf32, #tpu.memory_space<vmem>>, vector<1x64x64xf32>
    %40 = vector.shape_cast %39 : vector<1x64x64xf32> to vector<64x64xf32>
    %c1 = arith.constant 1 : index
    %c0_27 = arith.constant 0 : index
    %c0_28 = arith.constant 0 : index
    %41 = vector.load %arg7[%c1, %c0_27, %c0_28] : memref<7x3x64xf32, #tpu.memory_space<vmem>>, vector<1x3x64xf32>
    %42 = vector.shape_cast %41 : vector<1x3x64xf32> to vector<3x64xf32>
    %43 = vector.extract_strided_slice %42 {offsets = [0, 0], sizes = [1, 64], strides = [1, 1]} : vector<3x64xf32> to vector<1x64xf32>
    %44 = vector.extract_strided_slice %42 {offsets = [1, 0], sizes = [1, 64], strides = [1, 1]} : vector<3x64xf32> to vector<1x64xf32>
    %45 = vector.extract_strided_slice %42 {offsets = [2, 0], sizes = [1, 64], strides = [1, 1]} : vector<3x64xf32> to vector<1x64xf32>
    %46 = arith.truncf %38 : vector<8x64xf32> to vector<8x64xbf16>
    %47 = arith.truncf %40 : vector<64x64xf32> to vector<64x64xbf16>
    %cst_29 = arith.constant dense<0.000000e+00> : vector<8x64xf32>
    %48 = tpu.matmul %46, %47, %cst_29 {dimension_numbers = #tpu.dot_dimension_numbers<[1], [0], [0], [1], [0, 0, 1, 1], [], []>} : vector<8x64xbf16>, vector<64x64xbf16>, vector<8x64xf32> -> vector<8x64xf32>
    %49 = vector.broadcast %43 : vector<1x64xf32> to vector<8x64xf32>
    %50 = arith.addf %48, %49 : vector<8x64xf32>
    %cst_30 = arith.constant dense<0.000000e+00> : vector<64xf32>
    %51 = vector.multi_reduction <add>, %50, %cst_30 [0] : vector<8x64xf32> to vector<64xf32>
    %52 = vector.shape_cast %51 : vector<64xf32> to vector<1x64xf32>
    %cst_31 = arith.constant 8.000000e+00 : f32
    %53 = vector.broadcast %cst_31 : f32 to vector<1x64xf32>
    %54 = arith.divf %52, %53 : vector<1x64xf32>
    %55 = vector.broadcast %54 : vector<1x64xf32> to vector<8x64xf32>
    %56 = arith.subf %50, %55 : vector<8x64xf32>
    %57 = arith.mulf %56, %56 : vector<8x64xf32>
    %cst_32 = arith.constant dense<0.000000e+00> : vector<64xf32>
    %58 = vector.multi_reduction <add>, %57, %cst_32 [0] : vector<8x64xf32> to vector<64xf32>
    %59 = vector.shape_cast %58 : vector<64xf32> to vector<1x64xf32>
    %cst_33 = arith.constant 8.000000e+00 : f32
    %60 = vector.broadcast %cst_33 : f32 to vector<1x64xf32>
    %61 = arith.divf %59, %60 : vector<1x64xf32>
    %cst_34 = arith.constant 9.99999974E-6 : f32
    %62 = vector.broadcast %cst_34 : f32 to vector<1x64xf32>
    %63 = arith.addf %61, %62 : vector<1x64xf32>
    %64 = math.rsqrt %63 : vector<1x64xf32>
    %65 = arith.mulf %44, %64 : vector<1x64xf32>
    %66 = vector.broadcast %65 : vector<1x64xf32> to vector<8x64xf32>
    %67 = arith.mulf %56, %66 : vector<8x64xf32>
    %68 = vector.broadcast %45 : vector<1x64xf32> to vector<8x64xf32>
    %69 = arith.addf %67, %68 : vector<8x64xf32>
    %cst_35 = arith.constant 0.000000e+00 : f32
    %70 = vector.broadcast %cst_35 : f32 to vector<8x64xf32>
    %71 = arith.maximumf %69, %70 : vector<8x64xf32>
    %c1_36 = arith.constant 1 : index
    %c0_37 = arith.constant 0 : index
    %c0_38 = arith.constant 0 : index
    %72 = vector.load %arg3[%c1_36, %c0_37, %c0_38] : memref<5x64x64xf32, #tpu.memory_space<vmem>>, vector<1x64x64xf32>
    %73 = vector.shape_cast %72 : vector<1x64x64xf32> to vector<64x64xf32>
    %c2 = arith.constant 2 : index
    %c0_39 = arith.constant 0 : index
    %c0_40 = arith.constant 0 : index
    %74 = vector.load %arg7[%c2, %c0_39, %c0_40] : memref<7x3x64xf32, #tpu.memory_space<vmem>>, vector<1x3x64xf32>
    %75 = vector.shape_cast %74 : vector<1x3x64xf32> to vector<3x64xf32>
    %76 = vector.extract_strided_slice %75 {offsets = [0, 0], sizes = [1, 64], strides = [1, 1]} : vector<3x64xf32> to vector<1x64xf32>
    %77 = vector.extract_strided_slice %75 {offsets = [1, 0], sizes = [1, 64], strides = [1, 1]} : vector<3x64xf32> to vector<1x64xf32>
    %78 = vector.extract_strided_slice %75 {offsets = [2, 0], sizes = [1, 64], strides = [1, 1]} : vector<3x64xf32> to vector<1x64xf32>
    %79 = arith.truncf %71 : vector<8x64xf32> to vector<8x64xbf16>
    %80 = arith.truncf %73 : vector<64x64xf32> to vector<64x64xbf16>
    %cst_41 = arith.constant dense<0.000000e+00> : vector<8x64xf32>
    %81 = tpu.matmul %79, %80, %cst_41 {dimension_numbers = #tpu.dot_dimension_numbers<[1], [0], [0], [1], [0, 0, 1, 1], [], []>} : vector<8x64xbf16>, vector<64x64xbf16>, vector<8x64xf32> -> vector<8x64xf32>
    %82 = vector.broadcast %76 : vector<1x64xf32> to vector<8x64xf32>
    %83 = arith.addf %81, %82 : vector<8x64xf32>
    %cst_42 = arith.constant dense<0.000000e+00> : vector<64xf32>
    %84 = vector.multi_reduction <add>, %83, %cst_42 [0] : vector<8x64xf32> to vector<64xf32>
    %85 = vector.shape_cast %84 : vector<64xf32> to vector<1x64xf32>
    %cst_43 = arith.constant 8.000000e+00 : f32
    %86 = vector.broadcast %cst_43 : f32 to vector<1x64xf32>
    %87 = arith.divf %85, %86 : vector<1x64xf32>
    %88 = vector.broadcast %87 : vector<1x64xf32> to vector<8x64xf32>
    %89 = arith.subf %83, %88 : vector<8x64xf32>
    %90 = arith.mulf %89, %89 : vector<8x64xf32>
    %cst_44 = arith.constant dense<0.000000e+00> : vector<64xf32>
    %91 = vector.multi_reduction <add>, %90, %cst_44 [0] : vector<8x64xf32> to vector<64xf32>
    %92 = vector.shape_cast %91 : vector<64xf32> to vector<1x64xf32>
    %cst_45 = arith.constant 8.000000e+00 : f32
    %93 = vector.broadcast %cst_45 : f32 to vector<1x64xf32>
    %94 = arith.divf %92, %93 : vector<1x64xf32>
    %cst_46 = arith.constant 9.99999974E-6 : f32
    %95 = vector.broadcast %cst_46 : f32 to vector<1x64xf32>
    %96 = arith.addf %94, %95 : vector<1x64xf32>
    %97 = math.rsqrt %96 : vector<1x64xf32>
    %98 = arith.mulf %77, %97 : vector<1x64xf32>
    %99 = vector.broadcast %98 : vector<1x64xf32> to vector<8x64xf32>
    %100 = arith.mulf %89, %99 : vector<8x64xf32>
    %101 = vector.broadcast %78 : vector<1x64xf32> to vector<8x64xf32>
    %102 = arith.addf %100, %101 : vector<8x64xf32>
    %cst_47 = arith.constant 0.000000e+00 : f32
    %103 = vector.broadcast %cst_47 : f32 to vector<8x64xf32>
    %104 = arith.maximumf %102, %103 : vector<8x64xf32>
    %c2_48 = arith.constant 2 : index
    %c0_49 = arith.constant 0 : index
    %c0_50 = arith.constant 0 : index
    %105 = vector.load %arg3[%c2_48, %c0_49, %c0_50] : memref<5x64x64xf32, #tpu.memory_space<vmem>>, vector<1x64x64xf32>
    %106 = vector.shape_cast %105 : vector<1x64x64xf32> to vector<64x64xf32>
    %c3 = arith.constant 3 : index
    %c0_51 = arith.constant 0 : index
    %c0_52 = arith.constant 0 : index
    %107 = vector.load %arg7[%c3, %c0_51, %c0_52] : memref<7x3x64xf32, #tpu.memory_space<vmem>>, vector<1x3x64xf32>
    %108 = vector.shape_cast %107 : vector<1x3x64xf32> to vector<3x64xf32>
    %109 = vector.extract_strided_slice %108 {offsets = [0, 0], sizes = [1, 64], strides = [1, 1]} : vector<3x64xf32> to vector<1x64xf32>
    %110 = vector.extract_strided_slice %108 {offsets = [1, 0], sizes = [1, 64], strides = [1, 1]} : vector<3x64xf32> to vector<1x64xf32>
    %111 = vector.extract_strided_slice %108 {offsets = [2, 0], sizes = [1, 64], strides = [1, 1]} : vector<3x64xf32> to vector<1x64xf32>
    %112 = arith.truncf %104 : vector<8x64xf32> to vector<8x64xbf16>
    %113 = arith.truncf %106 : vector<64x64xf32> to vector<64x64xbf16>
    %cst_53 = arith.constant dense<0.000000e+00> : vector<8x64xf32>
    %114 = tpu.matmul %112, %113, %cst_53 {dimension_numbers = #tpu.dot_dimension_numbers<[1], [0], [0], [1], [0, 0, 1, 1], [], []>} : vector<8x64xbf16>, vector<64x64xbf16>, vector<8x64xf32> -> vector<8x64xf32>
    %115 = vector.broadcast %109 : vector<1x64xf32> to vector<8x64xf32>
    %116 = arith.addf %114, %115 : vector<8x64xf32>
    %cst_54 = arith.constant dense<0.000000e+00> : vector<64xf32>
    %117 = vector.multi_reduction <add>, %116, %cst_54 [0] : vector<8x64xf32> to vector<64xf32>
    %118 = vector.shape_cast %117 : vector<64xf32> to vector<1x64xf32>
    %cst_55 = arith.constant 8.000000e+00 : f32
    %119 = vector.broadcast %cst_55 : f32 to vector<1x64xf32>
    %120 = arith.divf %118, %119 : vector<1x64xf32>
    %121 = vector.broadcast %120 : vector<1x64xf32> to vector<8x64xf32>
    %122 = arith.subf %116, %121 : vector<8x64xf32>
    %123 = arith.mulf %122, %122 : vector<8x64xf32>
    %cst_56 = arith.constant dense<0.000000e+00> : vector<64xf32>
    %124 = vector.multi_reduction <add>, %123, %cst_56 [0] : vector<8x64xf32> to vector<64xf32>
    %125 = vector.shape_cast %124 : vector<64xf32> to vector<1x64xf32>
    %cst_57 = arith.constant 8.000000e+00 : f32
    %126 = vector.broadcast %cst_57 : f32 to vector<1x64xf32>
    %127 = arith.divf %125, %126 : vector<1x64xf32>
    %cst_58 = arith.constant 9.99999974E-6 : f32
    %128 = vector.broadcast %cst_58 : f32 to vector<1x64xf32>
    %129 = arith.addf %127, %128 : vector<1x64xf32>
    %130 = math.rsqrt %129 : vector<1x64xf32>
    %131 = arith.mulf %110, %130 : vector<1x64xf32>
    %132 = vector.broadcast %131 : vector<1x64xf32> to vector<8x64xf32>
    %133 = arith.mulf %122, %132 : vector<8x64xf32>
    %134 = vector.broadcast %111 : vector<1x64xf32> to vector<8x64xf32>
    %135 = arith.addf %133, %134 : vector<8x64xf32>
    %cst_59 = arith.constant 0.000000e+00 : f32
    %136 = vector.broadcast %cst_59 : f32 to vector<8x64xf32>
    %137 = arith.maximumf %135, %136 : vector<8x64xf32>
    %138 = arith.truncf %137 : vector<8x64xf32> to vector<8x64xbf16>
    %139 = arith.truncf %3 : vector<64x32xf32> to vector<64x32xbf16>
    %cst_60 = arith.constant dense<0.000000e+00> : vector<8x32xf32>
    %140 = tpu.matmul %138, %139, %cst_60 {dimension_numbers = #tpu.dot_dimension_numbers<[1], [0], [0], [1], [0, 0, 1, 1], [], []>} : vector<8x64xbf16>, vector<64x32xbf16>, vector<8x32xf32> -> vector<8x32xf32>
    %141 = vector.broadcast %6 : vector<1x32xf32> to vector<8x32xf32>
    %142 = arith.addf %140, %141 : vector<8x32xf32>
    %143 = vector.extract_strided_slice %142 {offsets = [0, 0], sizes = [8, 16], strides = [1, 1]} : vector<8x32xf32> to vector<8x16xf32>
    %144 = vector.extract_strided_slice %142 {offsets = [0, 16], sizes = [8, 16], strides = [1, 1]} : vector<8x32xf32> to vector<8x16xf32>
    %cst_61 = arith.constant 5.000000e-01 : f32
    %145 = vector.broadcast %cst_61 : f32 to vector<8x16xf32>
    %146 = arith.mulf %145, %144 : vector<8x16xf32>
    %147 = math.exp %146 : vector<8x16xf32>
    %148 = arith.mulf %1, %147 : vector<8x16xf32>
    %149 = arith.addf %148, %143 : vector<8x16xf32>
    %c4 = arith.constant 4 : index
    %c0_62 = arith.constant 0 : index
    %c0_63 = arith.constant 0 : index
    %150 = vector.load %arg7[%c4, %c0_62, %c0_63] : memref<7x3x64xf32, #tpu.memory_space<vmem>>, vector<1x3x64xf32>
    %151 = vector.shape_cast %150 : vector<1x3x64xf32> to vector<3x64xf32>
    %152 = vector.extract_strided_slice %151 {offsets = [0, 0], sizes = [1, 64], strides = [1, 1]} : vector<3x64xf32> to vector<1x64xf32>
    %153 = vector.extract_strided_slice %151 {offsets = [1, 0], sizes = [1, 64], strides = [1, 1]} : vector<3x64xf32> to vector<1x64xf32>
    %154 = vector.extract_strided_slice %151 {offsets = [2, 0], sizes = [1, 64], strides = [1, 1]} : vector<3x64xf32> to vector<1x64xf32>
    %155 = arith.truncf %149 : vector<8x16xf32> to vector<8x16xbf16>
    %156 = arith.truncf %4 : vector<16x64xf32> to vector<16x64xbf16>
    %cst_64 = arith.constant dense<0.000000e+00> : vector<8x64xf32>
    %157 = tpu.matmul %155, %156, %cst_64 {dimension_numbers = #tpu.dot_dimension_numbers<[1], [0], [0], [1], [0, 0, 1, 1], [], []>} : vector<8x16xbf16>, vector<16x64xbf16>, vector<8x64xf32> -> vector<8x64xf32>
    %158 = vector.broadcast %152 : vector<1x64xf32> to vector<8x64xf32>
    %159 = arith.addf %157, %158 : vector<8x64xf32>
    %cst_65 = arith.constant 0.000000e+00 : f32
    %160 = vector.broadcast %cst_65 : f32 to vector<8x64xf32>
    %161 = arith.maximumf %159, %160 : vector<8x64xf32>
    %cst_66 = arith.constant dense<0.000000e+00> : vector<64xf32>
    %162 = vector.multi_reduction <add>, %161, %cst_66 [0] : vector<8x64xf32> to vector<64xf32>
    %163 = vector.shape_cast %162 : vector<64xf32> to vector<1x64xf32>
    %cst_67 = arith.constant 8.000000e+00 : f32
    %164 = vector.broadcast %cst_67 : f32 to vector<1x64xf32>
    %165 = arith.divf %163, %164 : vector<1x64xf32>
    %166 = vector.broadcast %165 : vector<1x64xf32> to vector<8x64xf32>
    %167 = arith.subf %161, %166 : vector<8x64xf32>
    %168 = arith.mulf %167, %167 : vector<8x64xf32>
    %cst_68 = arith.constant dense<0.000000e+00> : vector<64xf32>
    %169 = vector.multi_reduction <add>, %168, %cst_68 [0] : vector<8x64xf32> to vector<64xf32>
    %170 = vector.shape_cast %169 : vector<64xf32> to vector<1x64xf32>
    %cst_69 = arith.constant 8.000000e+00 : f32
    %171 = vector.broadcast %cst_69 : f32 to vector<1x64xf32>
    %172 = arith.divf %170, %171 : vector<1x64xf32>
    %cst_70 = arith.constant 9.99999974E-6 : f32
    %173 = vector.broadcast %cst_70 : f32 to vector<1x64xf32>
    %174 = arith.addf %172, %173 : vector<1x64xf32>
    %175 = math.rsqrt %174 : vector<1x64xf32>
    %176 = arith.mulf %153, %175 : vector<1x64xf32>
    %177 = vector.broadcast %176 : vector<1x64xf32> to vector<8x64xf32>
    %178 = arith.mulf %167, %177 : vector<8x64xf32>
    %179 = vector.broadcast %154 : vector<1x64xf32> to vector<8x64xf32>
    %180 = arith.addf %178, %179 : vector<8x64xf32>
    %c3_71 = arith.constant 3 : index
    %c0_72 = arith.constant 0 : index
    %c0_73 = arith.constant 0 : index
    %181 = vector.load %arg3[%c3_71, %c0_72, %c0_73] : memref<5x64x64xf32, #tpu.memory_space<vmem>>, vector<1x64x64xf32>
    %182 = vector.shape_cast %181 : vector<1x64x64xf32> to vector<64x64xf32>
    %c5 = arith.constant 5 : index
    %c0_74 = arith.constant 0 : index
    %c0_75 = arith.constant 0 : index
    %183 = vector.load %arg7[%c5, %c0_74, %c0_75] : memref<7x3x64xf32, #tpu.memory_space<vmem>>, vector<1x3x64xf32>
    %184 = vector.shape_cast %183 : vector<1x3x64xf32> to vector<3x64xf32>
    %185 = vector.extract_strided_slice %184 {offsets = [0, 0], sizes = [1, 64], strides = [1, 1]} : vector<3x64xf32> to vector<1x64xf32>
    %186 = vector.extract_strided_slice %184 {offsets = [1, 0], sizes = [1, 64], strides = [1, 1]} : vector<3x64xf32> to vector<1x64xf32>
    %187 = vector.extract_strided_slice %184 {offsets = [2, 0], sizes = [1, 64], strides = [1, 1]} : vector<3x64xf32> to vector<1x64xf32>
    %188 = arith.truncf %180 : vector<8x64xf32> to vector<8x64xbf16>
    %189 = arith.truncf %182 : vector<64x64xf32> to vector<64x64xbf16>
    %cst_76 = arith.constant dense<0.000000e+00> : vector<8x64xf32>
    %190 = tpu.matmul %188, %189, %cst_76 {dimension_numbers = #tpu.dot_dimension_numbers<[1], [0], [0], [1], [0, 0, 1, 1], [], []>} : vector<8x64xbf16>, vector<64x64xbf16>, vector<8x64xf32> -> vector<8x64xf32>
    %191 = vector.broadcast %185 : vector<1x64xf32> to vector<8x64xf32>
    %192 = arith.addf %190, %191 : vector<8x64xf32>
    %cst_77 = arith.constant dense<0.000000e+00> : vector<64xf32>
    %193 = vector.multi_reduction <add>, %192, %cst_77 [0] : vector<8x64xf32> to vector<64xf32>
    %194 = vector.shape_cast %193 : vector<64xf32> to vector<1x64xf32>
    %cst_78 = arith.constant 8.000000e+00 : f32
    %195 = vector.broadcast %cst_78 : f32 to vector<1x64xf32>
    %196 = arith.divf %194, %195 : vector<1x64xf32>
    %197 = vector.broadcast %196 : vector<1x64xf32> to vector<8x64xf32>
    %198 = arith.subf %192, %197 : vector<8x64xf32>
    %199 = arith.mulf %198, %198 : vector<8x64xf32>
    %cst_79 = arith.constant dense<0.000000e+00> : vector<64xf32>
    %200 = vector.multi_reduction <add>, %199, %cst_79 [0] : vector<8x64xf32> to vector<64xf32>
    %201 = vector.shape_cast %200 : vector<64xf32> to vector<1x64xf32>
    %cst_80 = arith.constant 8.000000e+00 : f32
    %202 = vector.broadcast %cst_80 : f32 to vector<1x64xf32>
    %203 = arith.divf %201, %202 : vector<1x64xf32>
    %cst_81 = arith.constant 9.99999974E-6 : f32
    %204 = vector.broadcast %cst_81 : f32 to vector<1x64xf32>
    %205 = arith.addf %203, %204 : vector<1x64xf32>
    %206 = math.rsqrt %205 : vector<1x64xf32>
    %207 = arith.mulf %186, %206 : vector<1x64xf32>
    %208 = vector.broadcast %207 : vector<1x64xf32> to vector<8x64xf32>
    %209 = arith.mulf %198, %208 : vector<8x64xf32>
    %210 = vector.broadcast %187 : vector<1x64xf32> to vector<8x64xf32>
    %211 = arith.addf %209, %210 : vector<8x64xf32>
    %cst_82 = arith.constant 0.000000e+00 : f32
    %212 = vector.broadcast %cst_82 : f32 to vector<8x64xf32>
    %213 = arith.maximumf %211, %212 : vector<8x64xf32>
    %c4_83 = arith.constant 4 : index
    %c0_84 = arith.constant 0 : index
    %c0_85 = arith.constant 0 : index
    %214 = vector.load %arg3[%c4_83, %c0_84, %c0_85] : memref<5x64x64xf32, #tpu.memory_space<vmem>>, vector<1x64x64xf32>
    %215 = vector.shape_cast %214 : vector<1x64x64xf32> to vector<64x64xf32>
    %c6 = arith.constant 6 : index
    %c0_86 = arith.constant 0 : index
    %c0_87 = arith.constant 0 : index
    %216 = vector.load %arg7[%c6, %c0_86, %c0_87] : memref<7x3x64xf32, #tpu.memory_space<vmem>>, vector<1x3x64xf32>
    %217 = vector.shape_cast %216 : vector<1x3x64xf32> to vector<3x64xf32>
    %218 = vector.extract_strided_slice %217 {offsets = [0, 0], sizes = [1, 64], strides = [1, 1]} : vector<3x64xf32> to vector<1x64xf32>
    %219 = vector.extract_strided_slice %217 {offsets = [1, 0], sizes = [1, 64], strides = [1, 1]} : vector<3x64xf32> to vector<1x64xf32>
    %220 = vector.extract_strided_slice %217 {offsets = [2, 0], sizes = [1, 64], strides = [1, 1]} : vector<3x64xf32> to vector<1x64xf32>
    %221 = arith.truncf %213 : vector<8x64xf32> to vector<8x64xbf16>
    %222 = arith.truncf %215 : vector<64x64xf32> to vector<64x64xbf16>
    %cst_88 = arith.constant dense<0.000000e+00> : vector<8x64xf32>
    %223 = tpu.matmul %221, %222, %cst_88 {dimension_numbers = #tpu.dot_dimension_numbers<[1], [0], [0], [1], [0, 0, 1, 1], [], []>} : vector<8x64xbf16>, vector<64x64xbf16>, vector<8x64xf32> -> vector<8x64xf32>
    %224 = vector.broadcast %218 : vector<1x64xf32> to vector<8x64xf32>
    %225 = arith.addf %223, %224 : vector<8x64xf32>
    %cst_89 = arith.constant dense<0.000000e+00> : vector<64xf32>
    %226 = vector.multi_reduction <add>, %225, %cst_89 [0] : vector<8x64xf32> to vector<64xf32>
    %227 = vector.shape_cast %226 : vector<64xf32> to vector<1x64xf32>
    %cst_90 = arith.constant 8.000000e+00 : f32
    %228 = vector.broadcast %cst_90 : f32 to vector<1x64xf32>
    %229 = arith.divf %227, %228 : vector<1x64xf32>
    %230 = vector.broadcast %229 : vector<1x64xf32> to vector<8x64xf32>
    %231 = arith.subf %225, %230 : vector<8x64xf32>
    %232 = arith.mulf %231, %231 : vector<8x64xf32>
    %cst_91 = arith.constant dense<0.000000e+00> : vector<64xf32>
    %233 = vector.multi_reduction <add>, %232, %cst_91 [0] : vector<8x64xf32> to vector<64xf32>
    %234 = vector.shape_cast %233 : vector<64xf32> to vector<1x64xf32>
    %cst_92 = arith.constant 8.000000e+00 : f32
    %235 = vector.broadcast %cst_92 : f32 to vector<1x64xf32>
    %236 = arith.divf %234, %235 : vector<1x64xf32>
    %cst_93 = arith.constant 9.99999974E-6 : f32
    %237 = vector.broadcast %cst_93 : f32 to vector<1x64xf32>
    %238 = arith.addf %236, %237 : vector<1x64xf32>
    %239 = math.rsqrt %238 : vector<1x64xf32>
    %240 = arith.mulf %219, %239 : vector<1x64xf32>
    %241 = vector.broadcast %240 : vector<1x64xf32> to vector<8x64xf32>
    %242 = arith.mulf %231, %241 : vector<8x64xf32>
    %243 = vector.broadcast %220 : vector<1x64xf32> to vector<8x64xf32>
    %244 = arith.addf %242, %243 : vector<8x64xf32>
    %cst_94 = arith.constant 0.000000e+00 : f32
    %245 = vector.broadcast %cst_94 : f32 to vector<8x64xf32>
    %246 = arith.maximumf %244, %245 : vector<8x64xf32>
    %247 = arith.truncf %246 : vector<8x64xf32> to vector<8x64xbf16>
    %248 = arith.truncf %5 : vector<64x32xf32> to vector<64x32xbf16>
    %cst_95 = arith.constant dense<0.000000e+00> : vector<8x32xf32>
    %249 = tpu.matmul %247, %248, %cst_95 {dimension_numbers = #tpu.dot_dimension_numbers<[1], [0], [0], [1], [0, 0, 1, 1], [], []>} : vector<8x64xbf16>, vector<64x32xbf16>, vector<8x32xf32> -> vector<8x32xf32>
    %250 = vector.broadcast %7 : vector<1x32xf32> to vector<8x32xf32>
    %251 = arith.addf %249, %250 : vector<8x32xf32>
    %c0_96 = arith.constant 0 : index
    %c0_97 = arith.constant 0 : index
    %252 = vector.load %arg10[%c0_96, %c0_97] : memref<8x32xf32, #tpu.memory_space<vmem>>, vector<8x32xf32>
    tpu.vector_store %arg10[%c0_96, %c0_97], %251 {strides = array<i32>} : memref<8x32xf32, #tpu.memory_space<vmem>>, vector<8x32xf32>,
    %c0_98 = arith.constant 0 : index
    %c0_99 = arith.constant 0 : index
    %253 = vector.load %arg11[%c0_98, %c0_99] : memref<8x32xf32, #tpu.memory_space<vmem>>, vector<8x32xf32>
    tpu.vector_store %arg11[%c0_98, %c0_99], %142 {strides = array<i32>} : memref<8x32xf32, #tpu.memory_space<vmem>>, vector<8x32xf32>,
    %c0_100 = arith.constant 0 : index
    %c0_101 = arith.constant 0 : index
    %254 = vector.load %arg12[%c0_100, %c0_101] : memref<8x16xf32, #tpu.memory_space<vmem>>, vector<8x16xf32>
    tpu.vector_store %arg12[%c0_100, %c0_101], %149 {strides = array<i32>} : memref<8x16xf32, #tpu.memory_space<vmem>>, vector<8x16xf32>,
    return
  }
}

</mosaic_0001>

<bundles_post_ra>
// kernel: fc_vae_forward.1
= control target key start
LH: loop header
LB: loop body
LE: loop exit
PB: predicated region body
PF: predicated region fallthrough
CT: control target
= control target key end

     0   :  { %18 = vsyncpa [#allocation3], 0  ;;  %s1440_s0 = inlined_call_operand.vmem [shape: f32[8,32], index: 0, kind: input, shape index: {}]   ;;  %s1441_s1 = inlined_call_operand.vmem [shape: f32[8,16], index: 1, kind: input, shape index: {}]   ;;  %s1442_s2 = inlined_call_operand.vmem [shape: f32[32,64], index: 2, kind: input, shape index: {}]   ;;  %s1443_s3 = inlined_call_operand.hbm [shape: f32[5,64,64], index: 3, kind: input, shape index: {}]   ;;  %s1444_s4 = inlined_call_operand.vmem [shape: f32[64,32], index: 4, kind: input, shape index: {}]   ;;  %s1445_s5 = inlined_call_operand.vmem [shape: f32[16,64], index: 5, kind: input, shape index: {}]   ;;  %s1446_s6 = inlined_call_operand.vmem [shape: f32[64,32], index: 6, kind: input, shape index: {}]   ;;  %s1447_s7 = inlined_call_operand.vmem [shape: f32[7,3,64], index: 7, kind: input, shape index: {}]   ;;  %s1448_s8 = inlined_call_operand.vmem [shape: f32[1,32], index: 8, kind: input, shape index: {}]   ;;  %s1449_s9 = inlined_call_operand.vmem [shape: f32[1,32], index: 9, kind: input, shape index: {}]   ;;  %s1450_s10 = inlined_call_operand.hbm [shape: f32[8,32], index: 10, kind: output, shape index: {0}]   ;;  %s1451_s11 = inlined_call_operand.vmem [shape: f32[8,32], index: 11, kind: output, shape index: {1}]   ;;  %s1452_s12 = inlined_call_operand.hbm [shape: f32[8,16], index: 12, kind: output, shape index: {2}]  }
   0x1   :  { %19 = vsyncpa [#allocation4], 0 }
   0x2   :  { %20 = vsyncpa [#allocation7], 0  ;;  %s1129_s21 = smov [#allocation2]   ;;  %s1057_s25 = scalar_lea.hbm %s1443_s3, 5120 }
   0x3   :  { %s32_s22 = sshll.u32 %s1129_s21, 4  ;;  %p1058_p0 = scmp.ne.s32.totalorder %s1443_s3, %s1057_s25  ;;  %s33_s22 = int_to_ptr.vmem [resolvable:$true] %s32_s22 }
   0x4   :  { %p1061_p1 = scmp.lt.u32.totalorder %s1057_s25, %s1443_s3 }
   0x6   :  { %p1063_p2 = pnand %p1061_p1, %p1058_p0 }
   0x8   :  { %1066 = shalt.err (!%p1063_p2)
}
   0x9   :  { %s1067_s30 = scalar_lea.vmem %s33_s22, 5120  ;;  %p1072_p4 = scmp.lt.s32.totalorder %s33_s22, %s33_s22 }
   0xa   :  { %p1068_p3 = scmp.ne.s32.totalorder %s33_s22, %s1067_s30  ;;  %p1073_p5 = scmp.lt.s32.totalorder %s1067_s30, %s1067_s30 }
   0xc   :  { %p1074_p6 = por %p1073_p5, %p1072_p4 }
   0xe   :  { %p1075_p7 = pnand %p1074_p6, %p1068_p3 }
  0x10   :  { %1078 = shalt.err (!%p1075_p7)
}
  0x11   :  { %s1130_s13 = smov 128   ;;  %s1131_s14 = smov 8  }
  0x12   :  { %38 = dma.hbm_to_vmem [thread:$0]  %s1443_s3, 5120, %s33_s22, [#allocation3], %s1130_s13, %s1130_s13, %s1131_s14  }
  0x13   :  { %1123 = dma.done.wait [#allocation3], 5120  }
  0x14   :  { %1124 = vsyncadd [#allocation3], 4294962176  ;;  %v1132_v0 = vmov 0.0   ;;  %vm1133_vm0 = vmmov 0   ;;  %v57_v1 = vld [vmem:[%s1442_s2] sm:$0xff]  ;;  %v58_v2 = vld [vmem:[%s1442_s2 + $0x8] sm:$0xff]  ;;  %v85_v21 = vlaneseq }
  0x15   :  { %935 = vmatprep.subr.bf16.mxu1 %v1132_v0  ;;  %939 = vmatprep.mubr.msk.bf16.mxu1 %vm1133_vm0, %v1132_v0  ;;  %v59_v3 = vld [vmem:[%s1442_s2 + $0x10] sm:$0xff]  ;;  %v83_v4 = vpack.c.bf16 %v58_v2, %v57_v1  ;;  %v60_v5 = vld [vmem:[%s1442_s2 + $0x18] sm:$0xff]  ;;  %v55_v7 = vld [vmem:[%s1440_s0] sm:$0xff]  ;;  %vm89_vm1 = vcmask 261120   ;;  %vm134_vm2 = vcmask 523264   ;;  %vm522_vm3 = vcmask 130048  }
  0x16   :  { %955 = vmatprep.subr.bf16.mxu0 %v1132_v0  ;;  %963 = vmatprep.mubr.msk.bf16.mxu0 %vm1133_vm0, %v1132_v0  ;;  %v84_v6 = vpack.c.bf16 %v60_v5, %v59_v3  ;;  %v82_v8 = vpack.c.bf16 %v55_v7, %v55_v7  ;;  %v167_v9 = vld [vmem:[#allocation2] sm:$0xff]  ;;  %v168_v10 = vld [vmem:[#allocation2 + $0x8] sm:$0xff]  ;;  %v169_v12 = vld [vmem:[#allocation2 + $0x10] sm:$0xff]  ;;  %v86_v22 = vshrl.u32 %v85_v21, 7 }
  0x17   :  { %936 = vmatpush3.bf16.msra.mxu1 %v83_v4  ;;  %v178_v11 = vpack.c.bf16 %v168_v10, %v167_v9  ;;  %v170_v13 = vld [vmem:[#allocation2 + $0x18] sm:$0xff]  ;;  %v171_v15 = vld [vmem:[#allocation2 + $0x20] sm:$0xff]  ;;  %v172_v16 = vld [vmem:[#allocation2 + $0x28] sm:$0xff] }
  0x18   :  { %937 = vmatprep.subr.bf16.mxu1 %v1132_v0  ;;  %v179_v14 = vpack.c.bf16 %v170_v13, %v169_v12  ;;  %v180_v17 = vpack.c.bf16 %v172_v16, %v171_v15  ;;  %v173_v18 = vld [vmem:[#allocation2 + $0x30] sm:$0xff]  ;;  %v174_v19 = vld [vmem:[#allocation2 + $0x38] sm:$0xff]  ;;  %v1244_v23 = vsub.s32 0, %v86_v22  ;;  %v81_v24 = vld [vmem:[%s1447_s7] sm:$0x7]  ;;  %v1252_v51 = vsub.s32 1, %v86_v22 }
  0x19   :  { %v181_v20 = vpack.c.bf16 %v174_v19, %v173_v18  ;;  %v1254_v52 = vsub.s32 2, %v86_v22  ;;  %v262_v60 = vld [vmem:[#allocation2 + $0x40] sm:$0xff]  ;;  %v263_v61 = vld [vmem:[#allocation2 + $0x48] sm:$0xff]  ;;  %v264_v63 = vld [vmem:[#allocation2 + $0x50] sm:$0xff] }
  0x1a   :  { %v88_v25 = vrot.slane %v81_v24, %v1244_v23  ;;  %v273_v62 = vpack.c.bf16 %v263_v61, %v262_v60  ;;  %v265_v1 = vld [vmem:[#allocation2 + $0x58] sm:$0xff]  ;;  %v266_v3 = vld [vmem:[#allocation2 + $0x60] sm:$0xff]  ;;  %v267_v4 = vld [vmem:[#allocation2 + $0x68] sm:$0xff] }
  0x1b   :  { %938 = vmatpush3.bf16.msra.mxu1 %v84_v6  ;;  %v165_v56 = vrot.slane %v81_v24, %v1254_v52  ;;  %v274_v2 = vpack.c.bf16 %v265_v1, %v264_v63  ;;  %v275_v5 = vpack.c.bf16 %v267_v4, %v266_v3  ;;  %v268_v6 = vld [vmem:[#allocation2 + $0x70] sm:$0xff]  ;;  %v269_v7 = vld [vmem:[#allocation2 + $0x78] sm:$0xff]  ;;  %v879_v9 = vld [vmem:[%s1447_s7 + $0x4] sm:$0x7] }
  0x1c   :  { %943 = vmatprep.subr.bf16.mxu1 %v1132_v0  ;;  %956 = vmatpush3.bf16.msra.mxu0 %v273_v62  ;;  %v185_v10 = vrot.slane %v879_v9, %v1244_v23 }
  0x1d   :  { %957 = vmatprep.subr.bf16.mxu0 %v1132_v0 }
  0x1e   :  { %940 = vmatmul.mubr.msk.bf16.vlgmr.msra.gmra.mrb[0].mxu1 %vm89_vm1, %v82_v8  ;;  %v276_v8 = vpack.c.bf16 %v269_v7, %v268_v6 }
  0x1f   :  { %951 = vmatprep.mubr.msk.bf16.mxu1 %vm1133_vm0, %v1132_v0  ;;  %944 = vmatpush3.bf16.msra.mxu1 %v178_v11 }
  0x20   :  { %945 = vmatprep.subr.bf16.mxu1 %v1132_v0  ;;  %958 = vmatpush3.bf16.msra.mxu0 %v274_v2 }
  0x21   :  { %959 = vmatprep.subr.bf16.mxu0 %v1132_v0 }
  0x23   :  { %946 = vmatpush3.bf16.msra.mxu1 %v179_v14 }
  0x24   :  { %947 = vmatprep.subr.bf16.mxu1 %v1132_v0  ;;  %960 = vmatpush3.bf16.msra.mxu0 %v275_v5 }
  0x25   :  { %961 = vmatprep.subr.bf16.mxu0 %v1132_v0 }
  0x27   :  { %948 = vmatpush3.bf16.msra.mxu1 %v180_v17 }
  0x28   :  { %949 = vmatprep.subr.bf16.mxu1 %v1132_v0  ;;  %962 = vmatpush3.bf16.msra.mxu0 %v276_v8 }
  0x29   :  { %979 = vmatprep.subr.bf16.mxu0 %v1132_v0 }
  0x2b   :  { %950 = vmatpush3.bf16.msra.mxu1 %v181_v20 }
  0x2c   :  { %967 = vmatprep.subr.bf16.mxu1 %v1132_v0 }
  0xf1   :  { %v127_v26 = vpop.f32.mrb[0].mxu1 }
  0xf2   :  { %v128_v27 = vadd.f32 %v127_v26, %v88_v25  ;;  %v941_v28 = vpop.f32.mrb[1].mxu1 }
  0xf3   :  { %v130_v29 = vpop.f32.mrb[2].mxu1 }
  0xf4   :  { %v133_v30 = vmax.f32 %v128_v27, 0.0  ;;  %v942_v31 = vpop.f32.mrb[3].mxu1 }
  0xf6   :  { %v135_v32 = vsel %vm134_vm2, %v133_v30, 0.0 }
  0xf7   :  { %v136_v33 = vrot.slane %v135_v32, 4 }
  0xf9   :  { %v137_v34 = vadd.f32 %v136_v33, %v135_v32 }
  0xfb   :  { %v138_v35 = vrot.slane %v137_v34, 2 }
  0xfd   :  { %v139_v36 = vadd.f32 %v138_v35, %v137_v34 }
  0xff   :  { %v140_v37 = vrot.slane %v139_v36, 1 }
 0x101   :  { %v141_v38 = vadd.f32 %v140_v37, %v139_v36 }
 0x103   :  { %v143_v39 = vmul.f32 0.125, %v141_v38 }
 0x105   :  { %v144_v40 = vsub.f32 %v133_v30, %v143_v39  ;;  %v258_v39 = vrot.slane %v879_v9, %v1254_v52 }
 0x107   :  { %v145_v41 = vmul.f32 %v144_v40, %v144_v40 }
 0x109   :  { %v146_v42 = vsel %vm134_vm2, %v145_v41, 0.0 }
 0x10a   :  { %v147_v43 = vrot.slane %v146_v42, 4 }
 0x10c   :  { %v148_v44 = vadd.f32 %v147_v43, %v146_v42 }
 0x10e   :  { %v149_v45 = vrot.slane %v148_v44, 2 }
 0x110   :  { %v150_v46 = vadd.f32 %v149_v45, %v148_v44  ;;  %v357_v44 = vld [vmem:[#allocation2 + $0x80] sm:$0xff]  ;;  %v358_v45 = vld [vmem:[#allocation2 + $0x88] sm:$0xff] }
 0x112   :  { %v151_v47 = vrot.slane %v150_v46, 1 }
 0x114   :  { %v152_v48 = vadd.f32 %v151_v47, %v150_v46  ;;  %v368_v46 = vpack.c.bf16 %v358_v45, %v357_v44  ;;  %v359_v47 = vld [vmem:[#allocation2 + $0x90] sm:$0xff] }
 0x116   :  { %v153_v49 = vmul.f32 0.125, %v152_v48  ;;  %v360_v48 = vld [vmem:[#allocation2 + $0x98] sm:$0xff] }
 0x118   :  { %v154_v50 = vadd.f32 1e-05, %v153_v49  ;;  %v369_v49 = vpack.c.bf16 %v360_v48, %v359_v47 }
 0x11a   :  { %1041 = vrsqrt.f32 %v154_v50  ;;  %v361_v50 = vld [vmem:[#allocation2 + $0xa0] sm:$0xff] }
 0x124   :  { %v1042_v53 = vpop.eup %1041 }
 0x125   :  { %v156_v54 = vmul.f32 %v1042_v53, %v81_v24  ;;  %v362_v53 = vld [vmem:[#allocation2 + $0xa8] sm:$0xff] }
 0x127   :  { %v160_v55 = vrot.slane %v156_v54, %v1252_v51  ;;  %v370_v54 = vpack.c.bf16 %v362_v53, %v361_v50 }
 0x129   :  { %v161_v57 = vmul.f32 %v160_v55, %v144_v40  ;;  %v363_v55 = vld [vmem:[#allocation2 + $0xb0] sm:$0xff] }
 0x12b   :  { %v166_v58 = vadd.f32 %v165_v56, %v161_v57  ;;  %v364_v56 = vld [vmem:[#allocation2 + $0xb8] sm:$0xff] }
 0x12c   :  { %v371_v57 = vpack.c.bf16 %v364_v56, %v363_v55 }
 0x12d   :  { %v177_v59 = vpack.c.bf16 %v166_v58, %v166_v58  ;;  %v881_v58 = vld [vmem:[%s1447_s7 + $0x8] sm:$0x7] }
 0x12f   :  { %952 = vmatmul.mubr.msk.bf16.vlgmr.msra.gmra.mrb[4].mxu1 %vm134_vm2, %v177_v59  ;;  %v280_v59 = vrot.slane %v881_v58, %v1244_v23 }
 0x130   :  { %975 = vmatprep.mubr.msk.bf16.mxu1 %vm1133_vm0, %v1132_v0  ;;  %968 = vmatpush3.bf16.msra.mxu1 %v368_v46 }
 0x131   :  { %969 = vmatprep.subr.bf16.mxu1 %v1132_v0 }
 0x134   :  { %970 = vmatpush3.bf16.msra.mxu1 %v369_v49 }
 0x135   :  { %971 = vmatprep.subr.bf16.mxu1 %v1132_v0 }
 0x138   :  { %972 = vmatpush3.bf16.msra.mxu1 %v370_v54 }
 0x139   :  { %973 = vmatprep.subr.bf16.mxu1 %v1132_v0 }
 0x13c   :  { %974 = vmatpush3.bf16.msra.mxu1 %v371_v57 }
 0x13d   :  { %991 = vmatprep.subr.bf16.mxu1 %v1132_v0 }
 0x202   :  { %v223_v11 = vpop.f32.mrb[4].mxu1 }
 0x203   :  { %v224_v12 = vadd.f32 %v223_v11, %v185_v10  ;;  %v953_v13 = vpop.f32.mrb[5].mxu1 }
 0x204   :  { %v226_v14 = vpop.f32.mrb[6].mxu1 }
 0x205   :  { %v229_v15 = vsel %vm134_vm2, %v224_v12, 0.0  ;;  %v954_v16 = vpop.f32.mrb[7].mxu1 }
 0x206   :  { %v230_v17 = vrot.slane %v229_v15, 4 }
 0x208   :  { %v231_v18 = vadd.f32 %v230_v17, %v229_v15 }
 0x20a   :  { %v232_v19 = vrot.slane %v231_v18, 2 }
 0x20c   :  { %v233_v20 = vadd.f32 %v232_v19, %v231_v18 }
 0x20e   :  { %v234_v21 = vrot.slane %v233_v20, 1 }
 0x210   :  { %v235_v22 = vadd.f32 %v234_v21, %v233_v20 }
 0x212   :  { %v236_v24 = vmul.f32 0.125, %v235_v22 }
 0x214   :  { %v237_v25 = vsub.f32 %v224_v12, %v236_v24 }
 0x216   :  { %v238_v26 = vmul.f32 %v237_v25, %v237_v25 }
 0x218   :  { %v239_v27 = vsel %vm134_vm2, %v238_v26, 0.0 }
 0x219   :  { %v240_v28 = vrot.slane %v239_v27, 4 }
 0x21b   :  { %v241_v29 = vadd.f32 %v240_v28, %v239_v27 }
 0x21d   :  { %v242_v30 = vrot.slane %v241_v29, 2 }
 0x21f   :  { %v243_v31 = vadd.f32 %v242_v30, %v241_v29  ;;  %v61_v30 = vld [vmem:[%s1444_s4] sm:$0xff] }
 0x221   :  { %v244_v32 = vrot.slane %v243_v31, 1 }
 0x223   :  { %v245_v33 = vadd.f32 %v244_v32, %v243_v31  ;;  %v62_v31 = vld [vmem:[%s1444_s4 + $0x8] sm:$0xff] }
 0x224   :  { %v452_v32 = vpack.c.bf16 %v62_v31, %v61_v30 }
 0x225   :  { %v246_v34 = vmul.f32 0.125, %v245_v33  ;;  %v63_v33 = vld [vmem:[%s1444_s4 + $0x10] sm:$0xff] }
 0x227   :  { %v247_v35 = vadd.f32 1e-05, %v246_v34  ;;  %v64_v34 = vld [vmem:[%s1444_s4 + $0x18] sm:$0xff] }
 0x229   :  { %1043 = vrsqrt.f32 %v247_v35  ;;  %v453_v35 = vpack.c.bf16 %v64_v34, %v63_v33  ;;  %v599_v33 = vld [vmem:[#allocation2 + $0xc0] sm:$0xff]  ;;  %v600_v34 = vld [vmem:[#allocation2 + $0xc8] sm:$0xff] }
 0x233   :  { %v1044_v36 = vpop.eup %1043 }
 0x234   :  { %v249_v37 = vmul.f32 %v1044_v36, %v879_v9  ;;  %v65_v36 = vld [vmem:[%s1444_s4 + $0x20] sm:$0xff] }
 0x236   :  { %v253_v38 = vrot.slane %v249_v37, %v1252_v51  ;;  %v66_v37 = vld [vmem:[%s1444_s4 + $0x28] sm:$0xff] }
 0x238   :  { %v254_v40 = vmul.f32 %v253_v38, %v237_v25  ;;  %v353_v25 = vrot.slane %v881_v58, %v1254_v52  ;;  %v454_v38 = vpack.c.bf16 %v66_v37, %v65_v36  ;;  %v601_v36 = vld [vmem:[#allocation2 + $0xd0] sm:$0xff]  ;;  %v602_v37 = vld [vmem:[#allocation2 + $0xd8] sm:$0xff] }
 0x23a   :  { %v259_v41 = vadd.f32 %v258_v39, %v254_v40  ;;  %v67_v39 = vld [vmem:[%s1444_s4 + $0x30] sm:$0xff]  ;;  %v68_v40 = vld [vmem:[%s1444_s4 + $0x38] sm:$0xff] }
 0x23c   :  { %v260_v42 = vmax.f32 %v259_v41, 0.0  ;;  %v455_v41 = vpack.c.bf16 %v68_v40, %v67_v39  ;;  %v603_v39 = vld [vmem:[#allocation2 + $0xe0] sm:$0xff]  ;;  %v604_v40 = vld [vmem:[#allocation2 + $0xe8] sm:$0xff] }
 0x23e   :  { %v272_v43 = vpack.c.bf16 %v260_v42, %v260_v42  ;;  %v883_v42 = vld [vmem:[%s1447_s7 + $0xc] sm:$0x7] }
 0x240   :  { %964 = vmatmul.mubr.msk.bf16.vlgmr.msra.gmra.mrb[0].mxu0 %vm134_vm2, %v272_v43  ;;  %v375_v43 = vrot.slane %v883_v42, %v1244_v23 }
 0x241   :  { %987 = vmatprep.mubr.msk.bf16.mxu0 %vm1133_vm0, %v1132_v0  ;;  %980 = vmatpush3.bf16.msra.mxu0 %v452_v32 }
 0x242   :  { %981 = vmatprep.subr.bf16.mxu0 %v1132_v0 }
 0x245   :  { %982 = vmatpush3.bf16.msra.mxu0 %v453_v35  ;;  %v610_v35 = vpack.c.bf16 %v600_v34, %v599_v33 }
 0x246   :  { %983 = vmatprep.subr.bf16.mxu0 %v1132_v0 }
 0x249   :  { %984 = vmatpush3.bf16.msra.mxu0 %v454_v38  ;;  %v611_v38 = vpack.c.bf16 %v602_v37, %v601_v36 }
 0x24a   :  { %985 = vmatprep.subr.bf16.mxu0 %v1132_v0 }
 0x24d   :  { %986 = vmatpush3.bf16.msra.mxu0 %v455_v41  ;;  %v612_v41 = vpack.c.bf16 %v604_v40, %v603_v39 }
 0x24e   :  { %997 = vmatprep.subr.bf16.mxu0 %v1132_v0 }
 0x313   :  { %v318_v60 = vpop.f32.mrb[0].mxu0 }
 0x314   :  { %v319_v61 = vadd.f32 %v318_v60, %v280_v59  ;;  %v965_v62 = vpop.f32.mrb[1].mxu0 }
 0x315   :  { %v321_v63 = vpop.f32.mrb[2].mxu0 }
 0x316   :  { %v324_v1 = vsel %vm134_vm2, %v319_v61, 0.0  ;;  %v966_v2 = vpop.f32.mrb[3].mxu0 }
 0x317   :  { %v325_v3 = vrot.slane %v324_v1, 4 }
 0x319   :  { %v326_v4 = vadd.f32 %v325_v3, %v324_v1 }
 0x31b   :  { %v327_v5 = vrot.slane %v326_v4, 2 }
 0x31d   :  { %v328_v6 = vadd.f32 %v327_v5, %v326_v4 }
 0x31f   :  { %v329_v7 = vrot.slane %v328_v6, 1 }
 0x321   :  { %v330_v8 = vadd.f32 %v329_v7, %v328_v6 }
 0x323   :  { %v331_v9 = vmul.f32 0.125, %v330_v8 }
 0x325   :  { %v332_v10 = vsub.f32 %v319_v61, %v331_v9 }
 0x327   :  { %v333_v11 = vmul.f32 %v332_v10, %v332_v10 }
 0x329   :  { %v334_v12 = vsel %vm134_vm2, %v333_v11, 0.0 }
 0x32a   :  { %v335_v13 = vrot.slane %v334_v12, 4 }
 0x32c   :  { %v336_v14 = vadd.f32 %v335_v13, %v334_v12 }
 0x32e   :  { %v337_v15 = vrot.slane %v336_v14, 2 }
 0x330   :  { %v338_v16 = vadd.f32 %v337_v15, %v336_v14  ;;  %v69_v15 = vld [vmem:[%s1445_s5] sm:$0xff] }
 0x332   :  { %v339_v17 = vrot.slane %v338_v16, 1 }
 0x334   :  { %v340_v18 = vadd.f32 %v339_v17, %v338_v16  ;;  %v70_v16 = vld [vmem:[%s1445_s5 + $0x8] sm:$0xff]  ;;  %s1134_s5 = smov 112  }
 0x335   :  { %v517_v17 = vpack.c.bf16 %v70_v16, %v69_v15 }
 0x336   :  { %v341_v19 = vmul.f32 0.125, %v340_v18  ;;  %v885_v18 = vld [vmem:[%s1448_s8] ss:$0 sm:$0xff] }
 0x338   :  { %v342_v20 = vadd.f32 1e-05, %v341_v19 }
 0x33a   :  { %1045 = vrsqrt.f32 %v342_v20 }
 0x344   :  { %v1046_v21 = vpop.eup %1045 }
 0x345   :  { %v344_v22 = vmul.f32 %v1046_v21, %v881_v58 }
 0x347   :  { %v348_v24 = vrot.slane %v344_v22, %v1252_v51 }
 0x349   :  { %v349_v26 = vmul.f32 %v348_v24, %v332_v10  ;;  %v448_v10 = vrot.slane %v883_v42, %v1254_v52 }
 0x34b   :  { %v354_v27 = vadd.f32 %v353_v25, %v349_v26 }
 0x34d   :  { %v355_v28 = vmax.f32 %v354_v27, 0.0 }
 0x34f   :  { %v367_v29 = vpack.c.bf16 %v355_v28, %v355_v28  ;;  %v56_v28 = vld [vmem:[%s1441_s1] sm:$0xff] }
 0x351   :  { %976 = vmatmul.mubr.msk.bf16.vlgmr.msra.gmra.mrb[8].mxu1 %vm134_vm2, %v367_v29 }
 0x352   :  { %993 = vmatprep.mubr.msk.bf16.mxu1 %vm1133_vm0, %v1132_v0  ;;  %992 = vmatpush3.bf16.msra.mxu1 %v517_v17 }
 0x353   :  { %1009 = vmatprep.subr.bf16.mxu1 %v1132_v0 }
 0x424   :  { %v413_v44 = vpop.f32.mrb[8].mxu1 }
 0x425   :  { %v414_v45 = vadd.f32 %v413_v44, %v375_v43  ;;  %v977_v46 = vpop.f32.mrb[9].mxu1  ;;  %v606_v43 = vld [vmem:[#allocation2 + $0xf8] sm:$0xff] }
 0x426   :  { %v416_v47 = vpop.f32.mrb[10].mxu1 }
 0x427   :  { %v419_v48 = vsel %vm134_vm2, %v414_v45, 0.0  ;;  %v978_v49 = vpop.f32.mrb[11].mxu1 }
 0x428   :  { %v420_v50 = vrot.slane %v419_v48, 4 }
 0x42a   :  { %v421_v53 = vadd.f32 %v420_v50, %v419_v48 }
 0x42c   :  { %v422_v54 = vrot.slane %v421_v53, 2 }
 0x42e   :  { %v423_v55 = vadd.f32 %v422_v54, %v421_v53 }
 0x430   :  { %v424_v56 = vrot.slane %v423_v55, 1 }
 0x432   :  { %v425_v57 = vadd.f32 %v424_v56, %v423_v55 }
 0x434   :  { %v426_v58 = vmul.f32 0.125, %v425_v57 }
 0x436   :  { %v427_v59 = vsub.f32 %v414_v45, %v426_v58  ;;  %v887_v45 = vld [vmem:[%s1447_s7 + $0x10] sm:$0x7] }
 0x437   :  { %v521_v46 = vrot.slane %v887_v45, %v1244_v23 }
 0x438   :  { %v428_v60 = vmul.f32 %v427_v59, %v427_v59 }
 0x43a   :  { %v429_v61 = vsel %vm134_vm2, %v428_v60, 0.0 }
 0x43b   :  { %v430_v62 = vrot.slane %v429_v61, 4 }
 0x43d   :  { %v431_v63 = vadd.f32 %v430_v62, %v429_v61 }
 0x43f   :  { %v432_v1 = vrot.slane %v431_v63, 2 }
 0x441   :  { %v433_v2 = vadd.f32 %v432_v1, %v431_v63 }
 0x443   :  { %v434_v3 = vrot.slane %v433_v2, 1 }
 0x445   :  { %v435_v4 = vadd.f32 %v434_v3, %v433_v2 }
 0x447   :  { %v436_v5 = vmul.f32 0.125, %v435_v4 }
 0x449   :  { %v437_v6 = vadd.f32 1e-05, %v436_v5 }
 0x44b   :  { %1047 = vrsqrt.f32 %v437_v6 }
 0x455   :  { %v1048_v7 = vpop.eup %1047 }
 0x456   :  { %v439_v8 = vmul.f32 %v1048_v7, %v883_v42  ;;  %v605_v42 = vld [vmem:[#allocation2 + $0xf0] sm:$0xff] }
 0x457   :  { %v613_v44 = vpack.c.bf16 %v606_v43, %v605_v42 }
 0x458   :  { %v443_v9 = vrot.slane %v439_v8, %v1252_v51 }
 0x45a   :  { %v444_v11 = vmul.f32 %v443_v9, %v427_v59 }
 0x45c   :  { %v449_v12 = vadd.f32 %v448_v10, %v444_v11 }
 0x45e   :  { %v450_v13 = vmax.f32 %v449_v12, 0.0 }
 0x460   :  { %v451_v14 = vpack.c.bf16 %v450_v13, %v450_v13 }
 0x462   :  { %988 = vmatmul.mubr.msk.bf16.vlgmr.msra.gmra.mrb[4].mxu0 %vm134_vm2, %v451_v14  ;;  %v596_v14 = vrot.slane %v887_v45, %v1254_v52 }
 0x463   :  { %1005 = vmatprep.mubr.msk.bf16.mxu0 %vm1133_vm0, %v1132_v0  ;;  %998 = vmatpush3.bf16.msra.mxu0 %v610_v35 }
 0x464   :  { %999 = vmatprep.subr.bf16.mxu0 %v1132_v0 }
 0x467   :  { %1000 = vmatpush3.bf16.msra.mxu0 %v611_v38 }
 0x468   :  { %1001 = vmatprep.subr.bf16.mxu0 %v1132_v0 }
 0x46b   :  { %1002 = vmatpush3.bf16.msra.mxu0 %v612_v41 }
 0x46c   :  { %1003 = vmatprep.subr.bf16.mxu0 %v1132_v0 }
 0x46f   :  { %1004 = vmatpush3.bf16.msra.mxu0 %v613_v44 }
 0x470   :  { %1021 = vmatprep.subr.bf16.mxu0 %v1132_v0 }
 0x535   :  { %v499_v19 = vpop.f32.mrb[4].mxu0 }
 0x536   :  { %v500_v20 = vadd.f32 %v885_v18, %v499_v19  ;;  %v989_v21 = vpop.f32.mrb[5].mxu0  ;;  %v694_v18 = vld [vmem:[#allocation2 + $0x100] sm:$0xff]  ;;  %v695_v19 = vld [vmem:[#allocation2 + $0x108] sm:$0xff] }
 0x537   :  { %v502_v22 = vpop.f32.mrb[6].mxu0  ;;  %v696_v21 = vld [vmem:[#allocation2 + $0x110] sm:$0xff] }
 0x538   :  { %v505_v24 = vmul.f32 0.5, %v500_v20  ;;  %843 = vst.msk [vmem:[%s1451_s11] sm:$0xff] %vm89_vm1, %v500_v20  ;;  %v990_v25 = vpop.f32.mrb[7].mxu0  ;;  %v697_v22 = vld [vmem:[#allocation2 + $0x118] sm:$0xff] }
 0x539   :  { %v698_v25 = vld [vmem:[#allocation2 + $0x120] sm:$0xff] }
 0x53a   :  { %v506_v26 = vmul.f32 1.442695, %v505_v24  ;;  %v706_v24 = vpack.c.bf16 %v697_v22, %v696_v21 }
 0x53c   :  { %1049 = vpow2.f32 %v506_v26  ;;  %v699_v26 = vld [vmem:[#allocation2 + $0x128] sm:$0xff] }
 0x546   :  { %v1050_v27 = vpop.eup %1049 }
 0x547   :  { %509 = vrot.lane.b32.xlu0 %v1050_v27, %s1134_s5  ;;  %v707_v27 = vpack.c.bf16 %v699_v26, %v698_v25 }
 0x5b9   :  { %v510_v29 = vpop.permute.xlu0 %509 }
 0x5ba   :  { %v512_v30 = vmul.f32 %v510_v29, %v56_v28  ;;  %v700_v28 = vld [vmem:[#allocation2 + $0x130] sm:$0xff]  ;;  %v701_v29 = vld [vmem:[#allocation2 + $0x138] sm:$0xff] }
 0x5bc   :  { %v513_v31 = vadd.f32 %v512_v30, %v500_v20  ;;  %v705_v20 = vpack.c.bf16 %v695_v19, %v694_v18  ;;  %v708_v30 = vpack.c.bf16 %v701_v29, %v700_v28 }
 0x5be   :  { %v516_v32 = vpack.c.bf16 %v513_v31, %v513_v31  ;;  %844 = vst.msk [vmem:[#allocation6] sm:$0xff] %vm522_vm3, %v513_v31  ;;  %v889_v31 = vld [vmem:[%s1447_s7 + $0x14] sm:$0x7] }
 0x5c0   :  { %994 = vmatmul.mubr.msk.bf16.vlgmr.msra.gmra.mrb[12].mxu1 %vm522_vm3, %v516_v32  ;;  %v617_v32 = vrot.slane %v889_v31, %v1244_v23 }
 0x5c1   :  { %1017 = vmatprep.mubr.msk.bf16.mxu1 %vm1133_vm0, %v1132_v0  ;;  %1010 = vmatpush3.bf16.msra.mxu1 %v705_v20 }
 0x5c2   :  { %1011 = vmatprep.subr.bf16.mxu1 %v1132_v0 }
 0x5c5   :  { %1012 = vmatpush3.bf16.msra.mxu1 %v706_v24 }
 0x5c6   :  { %1013 = vmatprep.subr.bf16.mxu1 %v1132_v0 }
 0x5c9   :  { %1014 = vmatpush3.bf16.msra.mxu1 %v707_v27 }
 0x5ca   :  { %1015 = vmatprep.subr.bf16.mxu1 %v1132_v0 }
 0x5cd   :  { %1016 = vmatpush3.bf16.msra.mxu1 %v708_v30 }
 0x693   :  { %v560_v47 = vpop.f32.mrb[12].mxu1 }
 0x694   :  { %v561_v48 = vadd.f32 %v560_v47, %v521_v46  ;;  %v995_v49 = vpop.f32.mrb[13].mxu1 }
 0x695   :  { %v563_v50 = vpop.f32.mrb[14].mxu1 }
 0x696   :  { %v566_v53 = vmax.f32 %v561_v48, 0.0  ;;  %v996_v54 = vpop.f32.mrb[15].mxu1 }
 0x698   :  { %v567_v55 = vsel %vm134_vm2, %v566_v53, 0.0 }
 0x699   :  { %v568_v56 = vrot.slane %v567_v55, 4 }
 0x69b   :  { %v569_v57 = vadd.f32 %v568_v56, %v567_v55 }
 0x69d   :  { %v570_v58 = vrot.slane %v569_v57, 2 }
 0x69f   :  { %v571_v59 = vadd.f32 %v570_v58, %v569_v57 }
 0x6a1   :  { %v572_v60 = vrot.slane %v571_v59, 1 }
 0x6a3   :  { %v573_v61 = vadd.f32 %v572_v60, %v571_v59 }
 0x6a5   :  { %v574_v62 = vmul.f32 0.125, %v573_v61 }
 0x6a7   :  { %v575_v63 = vsub.f32 %v566_v53, %v574_v62  ;;  %v690_v62 = vrot.slane %v889_v31, %v1254_v52 }
 0x6a9   :  { %v576_v1 = vmul.f32 %v575_v63, %v575_v63 }
 0x6ab   :  { %v577_v2 = vsel %vm134_vm2, %v576_v1, 0.0 }
 0x6ac   :  { %v578_v3 = vrot.slane %v577_v2, 4 }
 0x6ae   :  { %v579_v4 = vadd.f32 %v578_v3, %v577_v2 }
 0x6b0   :  { %v580_v5 = vrot.slane %v579_v4, 2 }
 0x6b2   :  { %v581_v6 = vadd.f32 %v580_v5, %v579_v4  ;;  %v71_v4 = vld [vmem:[%s1446_s6] sm:$0xff]  ;;  %v72_v5 = vld [vmem:[%s1446_s6 + $0x8] sm:$0xff] }
 0x6b4   :  { %v582_v7 = vrot.slane %v581_v6, 1 }
 0x6b6   :  { %v583_v8 = vadd.f32 %v582_v7, %v581_v6  ;;  %v789_v6 = vpack.c.bf16 %v72_v5, %v71_v4  ;;  %v73_v7 = vld [vmem:[%s1446_s6 + $0x10] sm:$0xff] }
 0x6b8   :  { %v584_v9 = vmul.f32 0.125, %v583_v8  ;;  %v74_v8 = vld [vmem:[%s1446_s6 + $0x18] sm:$0xff] }
 0x6ba   :  { %v585_v10 = vadd.f32 1e-05, %v584_v9  ;;  %v790_v9 = vpack.c.bf16 %v74_v8, %v73_v7 }
 0x6bc   :  { %1051 = vrsqrt.f32 %v585_v10  ;;  %v75_v10 = vld [vmem:[%s1446_s6 + $0x20] sm:$0xff] }
 0x6c6   :  { %v1052_v11 = vpop.eup %1051 }
 0x6c7   :  { %v587_v12 = vmul.f32 %v1052_v11, %v887_v45  ;;  %v76_v11 = vld [vmem:[%s1446_s6 + $0x28] sm:$0xff] }
 0x6c9   :  { %v591_v13 = vrot.slane %v587_v12, %v1252_v51  ;;  %v791_v12 = vpack.c.bf16 %v76_v11, %v75_v10 }
 0x6cb   :  { %v592_v15 = vmul.f32 %v591_v13, %v575_v63  ;;  %v77_v13 = vld [vmem:[%s1446_s6 + $0x30] sm:$0xff] }
 0x6cd   :  { %v597_v16 = vadd.f32 %v596_v14, %v592_v15  ;;  %v78_v14 = vld [vmem:[%s1446_s6 + $0x38] sm:$0xff]  ;;  %s1135_s6 = smov [#allocation6]  }
 0x6ce   :  { %v792_v15 = vpack.c.bf16 %v78_v14, %v77_v13 }
 0x6cf   :  { %v609_v17 = vpack.c.bf16 %v597_v16, %v597_v16  ;;  %v891_v16 = vld [vmem:[%s1447_s7 + $0x18] sm:$0x7]  ;;  %s863_s7 = sshll.u32 %s1135_s6, 4  ;;  %s864_s7 = int_to_ptr.vmem [resolvable:$true] %s863_s7 }
 0x6d0   :  { %s1079_s15 = scalar_lea.vmem %s864_s7, 128  ;;  %p1084_p9 = scmp.lt.s32.totalorder %s864_s7, %s864_s7 }
 0x6d1   :  { %1006 = vmatmul.mubr.msk.bf16.vlgmr.msra.gmra.mrb[8].mxu0 %vm134_vm2, %v609_v17  ;;  %v712_v17 = vrot.slane %v891_v16, %v1244_v23  ;;  %p1080_p8 = scmp.ne.s32.totalorder %s864_s7, %s1079_s15  ;;  %p1085_p10 = scmp.lt.s32.totalorder %s1079_s15, %s1079_s15 }
 0x6d2   :  { %1029 = vmatprep.mubr.msk.bf16.mxu0 %vm1133_vm0, %v1132_v0  ;;  %1022 = vmatpush3.bf16.msra.mxu0 %v789_v6 }
 0x6d3   :  { %1023 = vmatprep.subr.bf16.mxu0 %v1132_v0  ;;  %p1086_p11 = por %p1085_p10, %p1084_p9 }
 0x6d5   :  { %p1087_p12 = pnand %p1086_p11, %p1080_p8 }
 0x6d6   :  { %1024 = vmatpush3.bf16.msra.mxu0 %v790_v9 }
 0x6d7   :  { %1025 = vmatprep.subr.bf16.mxu0 %v1132_v0 }
 0x6da   :  { %1026 = vmatpush3.bf16.msra.mxu0 %v791_v12 }
 0x6db   :  { %1027 = vmatprep.subr.bf16.mxu0 %v1132_v0 }
 0x6de   :  { %1028 = vmatpush3.bf16.msra.mxu0 %v792_v15 }
 0x7a4   :  { %v655_v33 = vpop.f32.mrb[8].mxu0 }
 0x7a5   :  { %v656_v34 = vadd.f32 %v655_v33, %v617_v32  ;;  %v1007_v35 = vpop.f32.mrb[9].mxu0 }
 0x7a6   :  { %v658_v36 = vpop.f32.mrb[10].mxu0 }
 0x7a7   :  { %v661_v37 = vsel %vm134_vm2, %v656_v34, 0.0  ;;  %v1008_v38 = vpop.f32.mrb[11].mxu0 }
 0x7a8   :  { %v662_v39 = vrot.slane %v661_v37, 4 }
 0x7aa   :  { %v663_v40 = vadd.f32 %v662_v39, %v661_v37 }
 0x7ac   :  { %v664_v41 = vrot.slane %v663_v40, 2 }
 0x7ae   :  { %v665_v42 = vadd.f32 %v664_v41, %v663_v40 }
 0x7b0   :  { %v666_v43 = vrot.slane %v665_v42, 1 }
 0x7b2   :  { %v667_v44 = vadd.f32 %v666_v43, %v665_v42 }
 0x7b4   :  { %v668_v45 = vmul.f32 0.125, %v667_v44  ;;  %v785_v44 = vrot.slane %v891_v16, %v1254_v52 }
 0x7b6   :  { %v669_v46 = vsub.f32 %v656_v34, %v668_v45 }
 0x7b8   :  { %v670_v47 = vmul.f32 %v669_v46, %v669_v46 }
 0x7ba   :  { %v671_v48 = vsel %vm134_vm2, %v670_v47, 0.0 }
 0x7bb   :  { %v672_v49 = vrot.slane %v671_v48, 4 }
 0x7bd   :  { %v673_v50 = vadd.f32 %v672_v49, %v671_v48 }
 0x7bf   :  { %v674_v53 = vrot.slane %v673_v50, 2 }
 0x7c1   :  { %v675_v54 = vadd.f32 %v674_v53, %v673_v50 }
 0x7c3   :  { %v676_v55 = vrot.slane %v675_v54, 1 }
 0x7c5   :  { %v677_v56 = vadd.f32 %v676_v55, %v675_v54 }
 0x7c7   :  { %v678_v57 = vmul.f32 0.125, %v677_v56 }
 0x7c9   :  { %v679_v58 = vadd.f32 1e-05, %v678_v57 }
 0x7cb   :  { %1053 = vrsqrt.f32 %v679_v58 }
 0x7d5   :  { %v1054_v59 = vpop.eup %1053 }
 0x7d6   :  { %v681_v60 = vmul.f32 %v1054_v59, %v889_v31 }
 0x7d8   :  { %v685_v61 = vrot.slane %v681_v60, %v1252_v51 }
 0x7da   :  { %v686_v63 = vmul.f32 %v685_v61, %v669_v46 }
 0x7dc   :  { %v691_v1 = vadd.f32 %v690_v62, %v686_v63 }
 0x7de   :  { %v692_v2 = vmax.f32 %v691_v1, 0.0 }
 0x7e0   :  { %v704_v3 = vpack.c.bf16 %v692_v2, %v692_v2 }
 0x7e2   :  { %1018 = vmatmul.mubr.msk.bf16.vlgmr.msra.gmra.mrb[16].mxu1 %vm134_vm2, %v704_v3 }
 0x8b5   :  { %v750_v18 = vpop.f32.mrb[16].mxu1 }
 0x8b6   :  { %v751_v19 = vadd.f32 %v750_v18, %v712_v17  ;;  %v1019_v20 = vpop.f32.mrb[17].mxu1 }
 0x8b7   :  { %v753_v0 = vpop.f32.mrb[18].mxu1 }
 0x8b8   :  { %v756_v21 = vsel %vm134_vm2, %v751_v19, 0.0  ;;  %v1020_v22 = vpop.f32.mrb[19].mxu1 }
 0x8b9   :  { %v757_v24 = vrot.slane %v756_v21, 4 }
 0x8bb   :  { %v758_v25 = vadd.f32 %v757_v24, %v756_v21 }
 0x8bd   :  { %v759_v26 = vrot.slane %v758_v25, 2 }
 0x8bf   :  { %v760_v27 = vadd.f32 %v759_v26, %v758_v25 }
 0x8c1   :  { %v761_v28 = vrot.slane %v760_v27, 1 }
 0x8c3   :  { %v762_v29 = vadd.f32 %v761_v28, %v760_v27 }
 0x8c5   :  { %v763_v30 = vmul.f32 0.125, %v762_v29 }
 0x8c7   :  { %v764_v31 = vsub.f32 %v751_v19, %v763_v30 }
 0x8c9   :  { %v765_v32 = vmul.f32 %v764_v31, %v764_v31 }
 0x8cb   :  { %v766_v33 = vsel %vm134_vm2, %v765_v32, 0.0 }
 0x8cc   :  { %v767_v34 = vrot.slane %v766_v33, 4 }
 0x8ce   :  { %v768_v23 = vadd.f32 %v767_v34, %v766_v33 }
 0x8d0   :  { %v769_v35 = vrot.slane %v768_v23, 2 }
 0x8d2   :  { %v770_v36 = vadd.f32 %v769_v35, %v768_v23 }
 0x8d4   :  { %v771_v37 = vrot.slane %v770_v36, 1 }
 0x8d6   :  { %v772_v38 = vadd.f32 %v771_v37, %v770_v36 }
 0x8d8   :  { %v773_v39 = vmul.f32 0.125, %v772_v38 }
 0x8da   :  { %v774_v40 = vadd.f32 1e-05, %v773_v39 }
 0x8dc   :  { %1055 = vrsqrt.f32 %v774_v40 }
 0x8e6   :  { %v1056_v41 = vpop.eup %1055 }
 0x8e7   :  { %v776_v42 = vmul.f32 %v1056_v41, %v891_v16 }
 0x8e9   :  { %v780_v43 = vrot.slane %v776_v42, %v1252_v51 }
 0x8eb   :  { %v781_v45 = vmul.f32 %v780_v43, %v764_v31 }
 0x8ed   :  { %v786_v46 = vadd.f32 %v785_v44, %v781_v45 }
 0x8ef   :  { %v787_v47 = vmax.f32 %v786_v46, 0.0 }
 0x8f1   :  { %v788_v48 = vpack.c.bf16 %v787_v47, %v787_v47 }
 0x8f3   :  { %1030 = vmatmul.mubr.msk.bf16.vlgmr.msra.gmra.mrb[12].mxu0 %vm134_vm2, %v788_v48 }
 0x8f4   :  { %1090 = shalt.err (!%p1087_p12)
}
 0x8f5   :  { %s1091_s17 = scalar_lea.hbm %s1452_s12, 128 }
 0x8f6   :  { %p1092_p13 = scmp.ne.s32.totalorder %s1452_s12, %s1091_s17  ;;  %p1095_p0 = scmp.lt.u32.totalorder %s1091_s17, %s1452_s12 }
 0x8f8   :  { %p1097_p1 = pnand %p1095_p0, %p1092_p13 }
 0x8fa   :  { %1100 = shalt.err (!%p1097_p1)
}
 0x8fb   :  { %866 = dma.vmem_to_hbm [thread:$0]  %s864_s7, 128, %s1452_s12, [#allocation7]   ;;  %v893_v51 = vld [vmem:[%s1449_s9] ss:$0 sm:$0xff] }
 0x8fc   :  { %s1136_s22 = smov [#allocation5]  }
 0x8fd   :  { %s851_s23 = sshll.u32 %s1136_s22, 4  ;;  %s852_s23 = int_to_ptr.vmem [resolvable:$true] %s851_s23 }
 0x8fe   :  { %s1101_s24 = scalar_lea.vmem %s852_s23, 128  ;;  %p1106_p3 = scmp.lt.s32.totalorder %s852_s23, %s852_s23 }
 0x8ff   :  { %p1102_p2 = scmp.ne.s32.totalorder %s852_s23, %s1101_s24  ;;  %p1107_p4 = scmp.lt.s32.totalorder %s1101_s24, %s1101_s24 }
 0x901   :  { %p1108_p5 = por %p1107_p4, %p1106_p3 }
 0x903   :  { %p1109_p6 = pnand %p1108_p5, %p1102_p2 }
 0x9c6   :  { %v836_v52 = vpop.f32.mrb[12].mxu0 }
 0x9c7   :  { %v837_v49 = vadd.f32 %v893_v51, %v836_v52  ;;  %v1031_v50 = vpop.f32.mrb[13].mxu0 }
 0x9c8   :  { %v839_v53 = vpop.f32.mrb[14].mxu0 }
 0x9c9   :  { %842 = vst.msk [vmem:[#allocation5] sm:$0xff] %vm89_vm1, %v837_v49  ;;  %v1032_v54 = vpop.f32.mrb[15].mxu0 }
 0x9ca   :  { %1112 = shalt.err (!%p1109_p6)
}
 0x9cb   :  { %s1113_s9 = scalar_lea.hbm %s1450_s10, 128 }
 0x9cc   :  { %p1114_p7 = scmp.ne.s32.totalorder %s1450_s10, %s1113_s9  ;;  %p1117_p8 = scmp.lt.u32.totalorder %s1113_s9, %s1450_s10 }
 0x9ce   :  { %p1119_p9 = pnand %p1117_p8, %p1114_p7 }
 0x9d0   :  { %1122 = shalt.err (!%p1119_p9)
}
 0x9d1   :  { %854 = dma.vmem_to_hbm [thread:$0]  %s852_s23, 128, %s1450_s10, [#allocation4]  }
 0x9d2   :  { %1125 = dma.done.wait [#allocation4], 128  }
 0x9d3   :  { %1126 = vsyncadd [#allocation4], 4294967168 }
 0x9d4   :  { %1127 = dma.done.wait [#allocation7], 128  }
 0x9d5   :  { %1128 = vsyncadd [#allocation7], 4294967168 }
 0x9d6   :  { %875 = vsyncpa [#allocation3], 1 }
 0x9d7   :  { %876 = vsyncpa [#allocation4], 1 }
 0x9d8   :  { %877 = vsyncpa [#allocation7], 1 }

</bundles_post_ra>
